<compile_context>
chip_gen: v7x
topology: tpu7x:2x2x1
jax: 0.10.0
libtpu: 0.0.40
codegen_flags: <defaults>
</compile_context>

<pallas_src>
import functools
import math

import jax
import jax.numpy as jnp
from jax import lax
from jax.experimental import pallas as pl
from jax.experimental.pallas import tpu as pltpu


# ----------------------------- configuration --------------------------------

class Mesh:
    n_levels = 8          # must be divisible by 4
    n_pr_vars = 4
    n_sfc_vars = 3
    n_pr = n_levels * n_pr_vars   # 32


class Config:
    latent_size = 32
    encdec_tr_depth = 1
    num_heads = 4
    window_size = (3, 2, 2)       # (d, h, w); wpad = window_size[2] // 2
    affine = True
    use_pole_convs = False
    tr_embedding = "sincos"
    checkpoint_type = None        # call_checkpointed is a no-op for forward


N_ADDL_VARS = 2
N_CONST_VARS = 2
SFC_CONV_DIMS = (96, 192, 512, Config.latent_size)

# Scoped-VMEM request: well under v7x's 64 MiB physical VMEM (leave headroom
# for Mosaic internal scratch); our double-buffered tiles stay < ~25 MiB.
_VMEM_LIMIT = 32 * 1024 * 1024
_TM_MAX = 1024        # raised: per-step overhead dominates the skinny matmuls
_CONV_TH_MAX = 16     # output rows per conv grid step
_ATTN_WB = 256        # windows per transformer grid step
_ATTN_GROUP = 8       # windows per dense (block-diagonal) attention matmul


def _round_up(x, m):
    return (x + m - 1) // m * m


def _largest_divisor(n, cap):
    for t in range(min(n, cap), 0, -1):
        if n % t == 0:
            return t
    return 1


@functools.lru_cache(maxsize=1)
def _num_tensorcores():
    # Megacore gating (review): only split M for core parallelism when the chip
    # actually has >1 TensorCore (v7x); on v5e/v6e the grid is a serial loop.
    # TODO(synk): no stable public TC-count API; best-effort, defaults to 1.
    try:
        return int(getattr(jax.devices()[0], "num_cores", 1) or 1)
    except Exception:
        return 1


def _split_dim(dim, cap):
    """Largest 128-multiple tile <= cap that exactly divides dim, else the full
    dim (a full-extent block is legal even when not 128-aligned).  Exact
    divisors fix the K/N tail-dropping hazard flagged in review."""
    for t in range(cap, 127, -128):
        if dim % t == 0:
            return t
    return dim


def _pick_tiles(M, K, N):
    tn = _split_dim(N, 512)
    tk = _split_dim(K, 512)
    if M > _TM_MAX:
        tm = _TM_MAX
    elif _num_tensorcores() > 1 and N // tn == 1 and 256 <= M and M % 16 == 0:
        tm = M // 2          # give both v7x TensorCores a tile
    else:
        tm = M
    return tm, tk, tn


# --------------------------- Pallas matmul kernel ----------------------------

def _matmul_kernel(a_ref, b_ref, bias_ref, o_ref, acc_ref, *, act):
    k = pl.program_id(2)

    @pl.when(k == 0)
    def _():
        acc_ref[...] = jnp.zeros_like(acc_ref)

    acc_ref[...] += jnp.dot(a_ref[...], b_ref[...],
                            preferred_element_type=jnp.float32)

    @pl.when(k == pl.num_programs(2) - 1)
    def _():
        r = acc_ref[...] + bias_ref[...]
        if act == "silu":
            r = r * jax.nn.sigmoid(r)
        o_ref[...] = r.astype(o_ref.dtype)


def pallas_matmul(a, b, bias=None, act=None, out_dtype=jnp.float32):
    """out = act(a @ b + bias); bf16 MXU operands, f32 accumulation.  K/N tiles
    are exact divisors (no tail dropped); only M is padded."""
    M, K = a.shape
    K2, N = b.shape
    assert K == K2
    tm, tk, tn = _pick_tiles(M, K, N)
    Mp = _round_up(M, tm)

    a_bf = a.astype(jnp.bfloat16)
    if Mp != M:
        a_bf = jnp.pad(a_bf, ((0, Mp - M), (0, 0)))
    b_bf = b.astype(jnp.bfloat16)
    if bias is None:
        bias = jnp.zeros((N,), jnp.float32)
    bias_p = bias.astype(jnp.float32).reshape(1, N)

    grid = (Mp // tm, N // tn, K // tk)
    cost = pl.CostEstimate(
        flops=2 * Mp * K * N,
        transcendentals=Mp * N if act else 0,
        bytes_accessed=Mp * K * 2 + K * N * 2 + N * 4
        + Mp * N * jnp.dtype(out_dtype).itemsize)

    out = pl.pallas_call(
        functools.partial(_matmul_kernel, act=act),
        out_shape=jax.ShapeDtypeStruct((Mp, N), out_dtype),
        grid=grid,
        in_specs=[
            pl.BlockSpec((tm, tk), lambda i, j, k: (i, k)),
            pl.BlockSpec((tk, tn), lambda i, j, k: (k, j)),
            pl.BlockSpec((1, tn), lambda i, j, k: (0, j)),
        ],
        out_specs=pl.BlockSpec((tm, tn), lambda i, j, k: (i, j)),
        scratch_shapes=[pltpu.VMEM((tm, tn), jnp.float32)],
        compiler_params=pltpu.CompilerParams(
            dimension_semantics=("parallel", "parallel", "arbitrary"),
            vmem_limit_bytes=_VMEM_LIMIT),
        cost_estimate=cost,
    )(a_bf, b_bf, bias_p)
    return out[:M] if Mp != M else out


# ------------------- Pallas 3x3 "earth" conv (fused im2col) -------------------

def _conv3x3_kernel(x_hbm, w_ref, bias_ref, o_ref, strip, sem, *,
                    stride, th, wo, act):
    """One grid step = `th` output rows of one image.  The input stays in HBM
    (pl.ANY); only the (th*stride + 2)-row halo strip is DMA'd into VMEM, and
    the nine tap matmuls accumulate directly on the MXU -- no patch tensor in
    HBM (review item #1)."""
    b = pl.program_id(0)
    i = pl.program_id(1)
    rows_in = th * stride + 2
    row0 = i * (th * stride)

    cp = pltpu.make_async_copy(x_hbm.at[b, pl.ds(row0, rows_in)], strip,
                               sem.at[0])
    cp.start()
    cp.wait()
    # TODO(synk): single-buffered strip; add a 2-slot prefetch if the exposed
    # DMA shows up at production scale.

    cout = o_ref.shape[-1]

    def row_body(t, carry):
        acc = jnp.zeros((wo, cout), jnp.float32)
        for r in range(3):
            row = t * stride + r
            for c in range(3):
                cs = pl.ds(c, wo) if stride == 1 else pl.ds(c, wo, stride)
                xs = strip[row, cs, :]                       # (wo, Cin) bf16
                acc = acc + jnp.dot(xs, w_ref[r * 3 + c],
                                    preferred_element_type=jnp.float32)
        res = acc + bias_ref[...]
        if act == "silu":
            res = res * jax.nn.sigmoid(res)
        o_ref[t] = res.astype(o_ref.dtype)
        return carry

    lax.fori_loop(0, th, row_body, 0)


def _pad_hw_circular(x):
    """Zero-pad latitude (H) by 1, circularly pad longitude (W) by 1, cast to
    bf16 -- one materialized copy (zeros + dynamic_update_slice) instead of the
    previous pad + concatenate pair."""
    B, H, W, C = x.shape
    xb = x.astype(jnp.bfloat16)
    xp = jnp.zeros((B, H + 2, W + 2, C), jnp.bfloat16)
    xp = lax.dynamic_update_slice(xp, xb, (0, 1, 1, 0))
    xp = lax.dynamic_update_slice(xp, xb[:, :, -1:], (0, 1, 0, 0))
    xp = lax.dynamic_update_slice(xp, xb[:, :, :1], (0, 1, W + 1, 0))
    return xp


def conv2d_earth(x, w, bias, stride, act=None, out_dtype=jnp.bfloat16):
    """3x3 earth conv (circular longitude, zero latitude padding), stride 1/2.
    x: (B, H, W, Cin) channels-last; w: (9, Cin, Cout) bf16 tap-major."""
    B, H, W, Cin = x.shape
    Cout = w.shape[-1]
    Ho = (H + 2 - 3) // stride + 1
    Wo = (W + 2 - 3) // stride + 1
    xp = _pad_hw_circular(x)                                  # (B, H+2, W+2, Cin)
    th = _largest_divisor(Ho, _CONV_TH_MAX)
    rows_in = th * stride + 2
    grid = (B, Ho // th)

    cost = pl.CostEstimate(
        flops=2 * B * Ho * Wo * 9 * Cin * Cout,
        transcendentals=B * Ho * Wo * Cout if act else 0,
        bytes_accessed=int(xp.size) * 2 + int(w.size) * 2
        + B * Ho * Wo * Cout * jnp.dtype(out_dtype).itemsize)

    return pl.pallas_call(
        functools.partial(_conv3x3_kernel, stride=stride, th=th, wo=Wo, act=act),
        out_shape=jax.ShapeDtypeStruct((B, Ho, Wo, Cout), out_dtype),
        grid=grid,
        in_specs=[
            pl.BlockSpec(memory_space=pl.ANY),                      # input in HBM
            pl.BlockSpec((9, Cin, Cout), lambda b, i: (0, 0, 0)),   # resident weight
            pl.BlockSpec((1, Cout), lambda b, i: (0, 0)),           # bias
        ],
        out_specs=pl.BlockSpec((None, th, Wo, Cout), lambda b, i: (b, i, 0, 0)),
        scratch_shapes=[pltpu.VMEM((rows_in, W + 2, Cin), jnp.bfloat16),
                        pltpu.SemaphoreType.DMA((1,))],
        compiler_params=pltpu.CompilerParams(
            dimension_semantics=("parallel", "parallel"),
            vmem_limit_bytes=_VMEM_LIMIT),
        cost_estimate=cost,
    )(xp, w, bias.astype(jnp.float32).reshape(1, Cout))


# ------------------ Pallas fused transformer layer (windowed) -----------------

def _tr_layer_kernel(x_ref, ln1g, ln1b, wqkv, bqkv, wproj, bproj,
                     ln2g, ln2b, wm1, bm1, wm2, bm2,
                     o_ref, qkv_sc, attn_sc, *, num_heads, win_len, group):
    """One grid step = a block of windows (flattened to (WB*L, C) rows).
    LN1 + QKV + windowed MHSA + out-proj + residual + LN2 + MLP + residual are
    all fused; QKV and attention outputs only ever exist in VMEM scratch."""
    C = x_ref.shape[-1]
    hd = C // num_heads
    gl = group * win_len
    scale = 1.0 / math.sqrt(hd)

    def layernorm(v, g_ref, b_ref):
        mu = jnp.mean(v, axis=-1, keepdims=True)
        var = jnp.mean(jnp.square(v - mu), axis=-1, keepdims=True)
        return (v - mu) * lax.rsqrt(var + 1e-5) * g_ref[...] + b_ref[...]

    x = x_ref[...].astype(jnp.float32)                         # (M, C) residual
    # ---- LN1 + fused QKV projection (lane-dense 3C scratch, never HBM) ----
    y = layernorm(x, ln1g, ln1b).astype(jnp.bfloat16)
    qkv_sc[...] = jnp.dot(y, wqkv[...],
                          preferred_element_type=jnp.float32) + bqkv[...]

    # ---- windowed MHSA: block-diagonal dense attention over `group` windows
    #      at a time -> big 2D MXU matmuls; each head writes its (gl, hd)
    #      result straight into a lane slice of the scratch (no concat). ----
    ii = lax.broadcasted_iota(jnp.int32, (gl, gl), 0) // win_len
    jj = lax.broadcasted_iota(jnp.int32, (gl, gl), 1) // win_len
    mask = jnp.where(ii == jj, 0.0, -1e30).astype(jnp.float32)
    n_groups = x_ref.shape[0] // gl

    def group_body(g, carry):
        rows = pl.ds(g * gl, gl)
        for h in range(num_heads):
            q = qkv_sc[rows, pl.ds(h * hd, hd)]
            k = qkv_sc[rows, pl.ds(C + h * hd, hd)]
            v = qkv_sc[rows, pl.ds(2 * C + h * hd, hd)]
            s = lax.dot_general(q * scale, k, (((1,), (1,)), ((), ())),
                                preferred_element_type=jnp.float32) + mask
            s = s - jnp.max(s, axis=-1, keepdims=True)
            p = jnp.exp(s)
            p = p / jnp.sum(p, axis=-1, keepdims=True)          # exact (review)
            attn_sc[rows, pl.ds(h * hd, hd)] = jnp.dot(
                p, v, preferred_element_type=jnp.float32)
        return carry

    lax.fori_loop(0, n_groups, group_body, 0)

    # ---- out-projection + residual ----
    x = x + jnp.dot(attn_sc[...].astype(jnp.bfloat16), wproj[...],
                    preferred_element_type=jnp.float32) + bproj[...]

    # ---- LN2 + MLP + residual ----
    y = layernorm(x, ln2g, ln2b).astype(jnp.bfloat16)
    h1 = jnp.dot(y, wm1[...], preferred_element_type=jnp.float32) + bm1[...]
    # TODO(synk): PyTorch nn.GELU defaults to exact erf; tanh approx used.
    h1 = jax.nn.gelu(h1, approximate=True).astype(jnp.bfloat16)
    x = x + jnp.dot(h1, wm2[...], preferred_element_type=jnp.float32) + bm2[...]
    o_ref[...] = x.astype(o_ref.dtype)


def slide_layers_3d(x, cfg, params):
    # TODO(synk): SlideLayers3D internals unavailable; stand-in = depth x
    # (pre-LN windowed MHSA + pre-LN MLP) over non-overlapping 3D windows.
    B, Dl, Hl, Wp, C = x.shape
    wd, wh, ww = cfg.window_size
    nh = cfg.num_heads
    assert Dl % wd == 0 and Hl % wh == 0 and Wp % ww == 0
    nd, nH, nW = Dl // wd, Hl // wh, Wp // ww
    L = wd * wh * ww

    xw = x.reshape(B, nd, wd, nH, wh, nW, ww, C)
    xw = jnp.transpose(xw, (0, 1, 3, 5, 2, 4, 6, 7)).reshape(-1, L, C)
    NW = xw.shape[0]

    group = _ATTN_GROUP
    wb = min(_ATTN_WB, _round_up(NW, group))    # windows per grid step
    NWp = _round_up(NW, wb)
    flat = xw.reshape(NW * L, C).astype(jnp.bfloat16)
    if NWp != NW:
        flat = jnp.pad(flat, ((0, (NWp - NW) * L), (0, 0)))

    blk_m = wb * L
    n_blocks = (NWp * L) // blk_m
    depth = len(params["tr_layers"])
    tok = NWp * L

    for li, lp in enumerate(params["tr_layers"]):
        weights = [lp["ln1_g"], lp["ln1_b"], lp["w_qkv"], lp["b_qkv"],
                   lp["w_proj"], lp["b_proj"], lp["ln2_g"], lp["ln2_b"],
                   lp["w_mlp1"], lp["b_mlp1"], lp["w_mlp2"], lp["b_mlp2"]]
        out_dtype = jnp.float32 if li == depth - 1 else jnp.bfloat16
        cost = pl.CostEstimate(
            flops=tok * (24 * C * C + 4 * group * L * C),
            transcendentals=tok * (4 * C + group * L * nh),
            bytes_accessed=tok * C * 2 + tok * C * jnp.dtype(out_dtype).itemsize)
        flat = pl.pallas_call(
            functools.partial(_tr_layer_kernel, num_heads=nh, win_len=L,
                              group=group),
            out_shape=jax.ShapeDtypeStruct((NWp * L, C), out_dtype),
            grid=(n_blocks,),
            in_specs=[pl.BlockSpec((blk_m, C), lambda i: (i, 0))]
            + [pl.BlockSpec(w.shape, lambda i: (0, 0)) for w in weights],
            out_specs=pl.BlockSpec((blk_m, C), lambda i: (i, 0)),
            scratch_shapes=[pltpu.VMEM((blk_m, 3 * C), jnp.float32),
                            pltpu.VMEM((blk_m, C), jnp.float32)],
            compiler_params=pltpu.CompilerParams(
                dimension_semantics=("parallel",),
                vmem_limit_bytes=_VMEM_LIMIT),
            cost_estimate=cost,
        )(flat, *weights)

    out = flat[:NW * L].reshape(B, nd, nH, nW, wd, wh, ww, C)
    out = jnp.transpose(out, (0, 1, 4, 2, 5, 3, 6, 7)).reshape(B, Dl, Hl, Wp, C)
    return out


# ------------------------- synthetic constant / time vars ---------------------

def get_additional_vars(t0, B, H, W):
    # TODO(synk): reference computes solar/time features; deterministic stand-in.
    lat = jnp.linspace(-1.0, 1.0, H)
    lon = jnp.linspace(0.0, 2.0 * jnp.pi, W, endpoint=False)
    tod = 2.0 * jnp.pi * (t0 % 86400) / 86400.0
    f1 = jnp.sin(lon[None, :] + tod) * jnp.cos(lat[:, None] * jnp.pi / 2)
    f2 = jnp.cos(lon[None, :] + tod) * jnp.cos(lat[:, None] * jnp.pi / 2)
    feats = jnp.stack([f1, f2], axis=-1)
    return jnp.broadcast_to(feats[None], (B, H, W, N_ADDL_VARS)).astype(jnp.float32)


def get_constant_vars(H, W):
    # TODO(synk): reference loads orography / land-sea mask; deterministic stand-in.
    lat = jnp.linspace(-1.0, 1.0, H)
    lon = jnp.linspace(0.0, 2.0 * jnp.pi, W, endpoint=False)
    c1 = jnp.cos(lat[:, None] * jnp.pi / 2) * jnp.ones((1, W))
    c2 = jnp.sin(2.0 * lon)[None, :] * jnp.ones((H, 1))
    return jnp.stack([c1, c2], axis=-1).astype(jnp.float32)   # (H, W, 2)


# ------------------------------ model components -------------------------------

def pressure_encoding(x, mesh, cfg, params):
    """Conv3d(Cpr->latent, k=(4,8,8), stride=(4,8,8)) as bf16 patchify + matmul."""
    B, H, W, _ = x.shape
    D, Cpr = mesh.n_levels, mesh.n_pr_vars
    kd, kh, kw = 4, 8, 8
    Do, Ho, Wo = D // kd, H // kh, W // kw
    x_pr = x[..., :D * Cpr].astype(jnp.bfloat16).reshape(B, H, W, Cpr, D)
    x_pr = jnp.transpose(x_pr, (0, 3, 4, 1, 2))             # (B, Cpr, D, H, W)
    x_pr = x_pr.reshape(B, Cpr, Do, kd, Ho, kh, Wo, kw)
    x_pr = jnp.transpose(x_pr, (0, 2, 4, 6, 1, 3, 5, 7))    # (B,Do,Ho,Wo,Cpr,kd,kh,kw)
    a = x_pr.reshape(B * Do * Ho * Wo, Cpr * kd * kh * kw)
    out = pallas_matmul(a, params["pr_wm"], params["pr_b"],
                        out_dtype=jnp.bfloat16)
    return out.reshape(B, Do, Ho, Wo, cfg.latent_size)


def surface_encoding(x, t0, mesh, cfg, params, const_data):
    B, H, W, _ = x.shape
    # TODO(synk): southpole_pad2d (pole-row padding) is treated as identity here.
    x_sfc = x[..., mesh.n_pr:]
    addl = get_additional_vars(t0, B, H, W)
    const = jnp.broadcast_to(const_data[None], (B, H, W, N_CONST_VARS))
    x_sfc = jnp.concatenate([x_sfc, addl, const], axis=-1)
    # TODO(synk): EarthConvEncoder2d internals (norm layers, pole convs) are not
    # in the provided source; a conv+SiLU stack with matching dims is used.
    x_sfc = conv2d_earth(x_sfc, params["sfc_w"][0], params["sfc_b"][0], 1, act="silu")
    x_sfc = conv2d_earth(x_sfc, params["sfc_w"][1], params["sfc_b"][1], 2, act="silu")
    x_sfc = conv2d_earth(x_sfc, params["sfc_w"][2], params["sfc_b"][2], 2, act="silu")
    x_sfc = conv2d_earth(x_sfc, params["sfc_w"][3], params["sfc_b"][3], 2, act=None)
    return x_sfc                                             # (B, H/8, W/8, latent)


def posemb_sincos_3d(D, H, W, C, temperature=10000.0):
    # TODO(synk): exact reference posemb_sincos_3d unavailable; standard 3-axis
    # sin/cos embedding, zero-padded to C channels.
    fdim = max(C // 6, 1)
    z, y, x = jnp.meshgrid(jnp.arange(D, dtype=jnp.float32),
                           jnp.arange(H, dtype=jnp.float32),
                           jnp.arange(W, dtype=jnp.float32), indexing="ij")
    omega = 1.0 / (temperature ** (jnp.arange(fdim, dtype=jnp.float32) / fdim))

    def enc(p):
        a = p[..., None] * omega
        return jnp.concatenate([jnp.sin(a), jnp.cos(a)], axis=-1)

    pe = jnp.concatenate([enc(z), enc(y), enc(x)], axis=-1)[..., :C]
    return jnp.pad(pe, ((0, 0), (0, 0), (0, 0), (0, C - pe.shape[-1])))


def embed(x_pr, x_sfc, cfg):
    x_pr = x_pr[:, :, :90]      # crop latent latitude rows (torch :90 crop)
    x_sfc = x_sfc[:, :90]
    x = jnp.concatenate([x_pr, x_sfc[:, None]], axis=1)      # (B, Dl, Hl, Wl, C)
    B, Dl, Hl, Wl, C = x.shape
    if cfg.tr_embedding == "sincos":
        x = x + posemb_sincos_3d(Dl, Hl, Wl, C).astype(x.dtype)[None]
    wpad = cfg.window_size[2] // 2
    if wpad > 0:  # earth_pad3d: circular pad along longitude
        x = jnp.concatenate([x[:, :, :, -wpad:], x, x[:, :, :, :wpad]], axis=3)
    return x      # (B, Dl, Hl, Wl + 2*wpad, C) bf16


def res_conv_encoder_forward(x, t0, mesh, cfg, params, const_data):
    # call_checkpointed == gradient checkpointing -> identity for the forward.
    x_pr = pressure_encoding(x, mesh, cfg, params)
    x_sfc = surface_encoding(x, t0, mesh, cfg, params, const_data)
    x_emb = embed(x_pr, x_sfc, cfg)
    return slide_layers_3d(x_emb, cfg, params)


# -------------------------------- parameters -----------------------------------

def init_params(key, mesh, cfg):
    """Weights generated in PyTorch layouts, then pre-reshaped / cast once to the
    layouts the Pallas kernels consume (not per call)."""
    total_sfc = mesh.n_sfc_vars + N_ADDL_VARS + N_CONST_VARS
    keys = iter(jax.random.split(key, 64))

    def w(shape, scale=0.02):
        return (scale * jax.random.normal(next(keys), shape)).astype(jnp.float32)

    C = cfg.latent_size
    pr_w = w((C, mesh.n_pr_vars, 4, 8, 8))       # PyTorch Conv3d layout
    params = {
        "pr_wm": pr_w.reshape(C, -1).T.astype(jnp.bfloat16),   # (1024, C)
        "pr_b": jnp.zeros((C,), jnp.float32),
        "sfc_w": [], "sfc_b": [], "tr_layers": [],
    }
    cin = total_sfc
    for cout in SFC_CONV_DIMS:
        wc = w((cout, cin, 3, 3))                               # PyTorch layout
        # tap-major (9, Cin, Cout): matches the in-kernel tap loop.
        params["sfc_w"].append(
            jnp.transpose(wc, (2, 3, 1, 0)).reshape(9, cin, cout).astype(jnp.bfloat16))
        params["sfc_b"].append(jnp.zeros((cout,), jnp.float32))
        cin = cout

    def vec(n, val=0.0):
        return jnp.full((1, n), val, jnp.float32)

    for _ in range(cfg.encdec_tr_depth):
        params["tr_layers"].append({
            "ln1_g": vec(C, 1.0), "ln1_b": vec(C),
            "w_qkv": w((C, 3 * C)).astype(jnp.bfloat16), "b_qkv": vec(3 * C),
            "w_proj": w((C, C)).astype(jnp.bfloat16), "b_proj": vec(C),
            "ln2_g": vec(C, 1.0), "ln2_b": vec(C),
            "w_mlp1": w((C, 4 * C)).astype(jnp.bfloat16), "b_mlp1": vec(4 * C),
            "w_mlp2": w((4 * C, C)).astype(jnp.bfloat16), "b_mlp2": vec(C),
        })
    return params


# ----------------------------------- main ---------------------------------------

if __name__ == "__main__":
    mesh, cfg = Mesh(), Config()
    B, H, W = 2, 16, 16
    C_in = mesh.n_pr + mesh.n_sfc_vars     # 32 pressure-level*vars + 3 sfc = 35

    key = jax.random.PRNGKey(0)
    kx, kp = jax.random.split(key)
    x = jax.random.normal(kx, (B, H, W, C_in), dtype=jnp.float32)
    t0 = 1700000000  # synthetic timestamp

    params = init_params(kp, mesh, cfg)
    const_data = get_constant_vars(H, W)

    out = res_conv_encoder_forward(x, t0, mesh, cfg, params, const_data)
    out = jax.block_until_ready(out)

    Dl = mesh.n_levels // 4 + 1
    Wp = W // 8 + 2 * (cfg.window_size[2] // 2)
    assert out.shape == (B, Dl, H // 8, Wp, cfg.latent_size), out.shape
    assert jnp.all(jnp.isfinite(out))
    print("KERNEL_OK")
</pallas_src>

<mosaic_0001>
module attributes {stable_mosaic.version = 11 : i64} {
  func.func @_matmul_kernel(%arg0: i32, %arg1: i32, %arg2: i32, %arg3: memref<16x512xbf16, #tpu.memory_space<vmem>>, %arg4: memref<512x32xbf16, #tpu.memory_space<vmem>>, %arg5: memref<1x32xf32, #tpu.memory_space<vmem>>, %arg6: memref<16x32xbf16, #tpu.memory_space<vmem>>, %arg7: memref<16x32xf32, #tpu.memory_space<vmem>>) attributes {dimension_semantics = [#tpu.dimension_semantics<parallel>, #tpu.dimension_semantics<parallel>, #tpu.dimension_semantics<arbitrary>], iteration_bounds = array<i64: 1, 1, 2>, scalar_prefetch = 0 : i64, scratch_operands = 1 : i64, tpu.core_type = #tpu.core_type<tc>, window_params = [{transform_indices = @transform_0, window_bounds = array<i64: 16, 512>}, {transform_indices = @transform_1, window_bounds = array<i64: 512, 32>}, {transform_indices = @transform_2, window_bounds = array<i64: 1, 32>}, {transform_indices = @transform_3, window_bounds = array<i64: 16, 32>}]} {
    %c0_i32 = arith.constant 0 : i32
    %0 = arith.cmpi eq, %arg2, %c0_i32 : i32
    %1 = arith.extui %0 : i1 to i32
    %c0_i32_0 = arith.constant 0 : i32
    %2 = arith.cmpi ne, %1, %c0_i32_0 : i32
    scf.if %2 {
      %cst_9 = arith.constant 0.000000e+00 : f32
      %12 = vector.broadcast %cst_9 : f32 to vector<16x32xf32>
      %c0_10 = arith.constant 0 : index
      %c0_11 = arith.constant 0 : index
      %13 = vector.load %arg7[%c0_10, %c0_11] : memref<16x32xf32, #tpu.memory_space<vmem>>, vector<16x32xf32>
      tpu.vector_store %arg7[%c0_10, %c0_11], %12 {strides = array<i32>} : memref<16x32xf32, #tpu.memory_space<vmem>>, vector<16x32xf32>,
    } else {
    }
    %c0 = arith.constant 0 : index
    %c0_1 = arith.constant 0 : index
    %3 = vector.load %arg7[%c0, %c0_1] : memref<16x32xf32, #tpu.memory_space<vmem>>, vector<16x32xf32>
    %c0_2 = arith.constant 0 : index
    %c0_3 = arith.constant 0 : index
    %4 = vector.load %arg3[%c0_2, %c0_3] : memref<16x512xbf16, #tpu.memory_space<vmem>>, vector<16x512xbf16>
    %c0_4 = arith.constant 0 : index
    %c0_5 = arith.constant 0 : index
    %5 = vector.load %arg4[%c0_4, %c0_5] : memref<512x32xbf16, #tpu.memory_space<vmem>>, vector<512x32xbf16>
    %cst = arith.constant dense<0.000000e+00> : vector<16x32xf32>
    %6 = tpu.matmul %4, %5, %cst {dimension_numbers = #tpu.dot_dimension_numbers<[1], [0], [0], [1], [0, 0, 1, 1], [], []>} : vector<16x512xbf16>, vector<512x32xbf16>, vector<16x32xf32> -> vector<16x32xf32>
    %7 = arith.addf %3, %6 : vector<16x32xf32>
    %c0_6 = arith.constant 0 : index
    %c0_7 = arith.constant 0 : index
    %8 = vector.load %arg7[%c0_6, %c0_7] : memref<16x32xf32, #tpu.memory_space<vmem>>, vector<16x32xf32>
    tpu.vector_store %arg7[%c0_6, %c0_7], %7 {strides = array<i32>} : memref<16x32xf32, #tpu.memory_space<vmem>>, vector<16x32xf32>,
    %c1_i32 = arith.constant 1 : i32
    %9 = arith.cmpi eq, %arg2, %c1_i32 : i32
    %10 = arith.extui %9 : i1 to i32
    %c0_i32_8 = arith.constant 0 : i32
    %11 = arith.cmpi ne, %10, %c0_i32_8 : i32
    scf.if %11 {
      %c0_9 = arith.constant 0 : index
      %c0_10 = arith.constant 0 : index
      %12 = vector.load %arg7[%c0_9, %c0_10] : memref<16x32xf32, #tpu.memory_space<vmem>>, vector<16x32xf32>
      %c0_11 = arith.constant 0 : index
      %c0_12 = arith.constant 0 : index
      %13 = vector.load %arg5[%c0_11, %c0_12] : memref<1x32xf32, #tpu.memory_space<vmem>>, vector<1x32xf32>
      %14 = vector.broadcast %13 : vector<1x32xf32> to vector<16x32xf32>
      %15 = arith.addf %12, %14 : vector<16x32xf32>
      %16 = arith.truncf %15 : vector<16x32xf32> to vector<16x32xbf16>
      %c0_13 = arith.constant 0 : index
      %c0_14 = arith.constant 0 : index
      %17 = vector.load %arg6[%c0_13, %c0_14] : memref<16x32xbf16, #tpu.memory_space<vmem>>, vector<16x32xbf16>
      tpu.vector_store %arg6[%c0_13, %c0_14], %16 {strides = array<i32>} : memref<16x32xbf16, #tpu.memory_space<vmem>>, vector<16x32xbf16>,
    } else {
    }
    return
  }
  func.func @transform_0(%arg0: i32, %arg1: i32, %arg2: i32) -> (i32, i32) {
    %c0_i32 = arith.constant 0 : i32
    return %arg0, %arg2 : i32, i32
  }
  func.func @transform_1(%arg0: i32, %arg1: i32, %arg2: i32) -> (i32, i32) {
    %c0_i32 = arith.constant 0 : i32
    return %arg2, %arg1 : i32, i32
  }
  func.func @transform_2(%arg0: i32, %arg1: i32, %arg2: i32) -> (i32, i32) {
    %c0_i32 = arith.constant 0 : i32
    %c0_i32_0 = arith.constant 0 : i32
    return %c0_i32, %arg1 : i32, i32
  }
  func.func @transform_3(%arg0: i32, %arg1: i32, %arg2: i32) -> (i32, i32) {
    %c0_i32 = arith.constant 0 : i32
    return %arg0, %arg1 : i32, i32
  }
}

</mosaic_0001>

<bundles_post_ra>
// kernel: tpu_custom_call.1
= control target key start
LH: loop header
LB: loop body
LE: loop exit
PB: predicated region body
PF: predicated region fallthrough
CT: control target
= control target key end

     0   :  { %8 = vsyncpa [#allocation5], 0  ;;  %s1056_s12 = smov 0   ;;  %s1058_s13 = smov 0   ;;  %s1195_s0 = inlined_call_operand.vmem [shape: bf16[16,1024], index: 0, kind: input, shape index: {}]   ;;  %s1196_s1 = inlined_call_operand.vmem [shape: bf16[1024,32], index: 1, kind: input, shape index: {}]   ;;  %s1197_s2 = inlined_call_operand.vmem [shape: f32[1,32], index: 2, kind: input, shape index: {}]   ;;  %s1198_s3 = inlined_call_operand.hbm [shape: bf16[16,32], index: 3, kind: output, shape index: {}]  }
   0x1   :  { %s1060_s14 = smov 0   ;;  %s1062_s15 = smov 0  }
   0x2   :  { %s1064_s16 = smov 0  }
   0x3 LB: > { %s771_s17 = sadd.s32 4294967295, %s1030_s16   ;;  %s26_s18 = sadd.s32 1, %s1026_s15  ;;  %s1030_s16 = sphi %s1064_s16, %s14_s16   ;;  %s1026_s15 = sphi %s1062_s15, %s1203_s15   ;;  %s1022_s14 = sphi %s1060_s14, %s1202_s14   ;;  %s1018_s13 = sphi %s1058_s13, %s1201_s13   ;;  %s1014_s12 = sphi %s1056_s12, %s1200_s12  }
   0x4   : > { %p27_p0 = scmp.ge.s32.totalorder %s26_s18, 2  ;;  %p49_p1 = scmp.ne.s32.totalorder %s1018_s13, %s1014_s12 }
   0x5   : > { %p50_p2 = scmp.eq.s32.totalorder %s1030_s16, 0  ;;  %s42_s20 = sadd.s32 1, %s1018_s13 }
   0x6   : > { %s1205_s18 = smov (%p27_p0, %s26_s18), 0  ;;  %p774_p5 = scmp.ge.s32.totalorder %s1030_s16, 2 }
   0x7   : > { %p51_p3 = por %p50_p2, %p49_p1  ;;  %s38_s19 = ssub.s32 %s1026_s15, %s1205_s18 }
   0x8   : > { %p40_p4 = scmp.eq.s32.totalorder %s38_s19, 0  ;;  %163 = sbr.rel (%p774_p5) target bundleno = 22 (0x16), region = 20 }
   0xa   : > { %s1092_s21 = scalar_select %p40_p4, %s1018_s13, %s42_s20  }
   0xf   : > { %166 = sbr.rel (!%p51_p3) target bundleno = 22 (0x16), region = 24  ;;  %s168_s22 = sand.u32 (%p51_p3), 1, %s1018_s13  }
  0x10   : > { %s827_s23 = sshll.u32 (%p51_p3), %s1026_s15, 4  ;;  %s775_s24 = sshll.u32 (%p51_p3), %s168_s22, 5 }
  0x11   : > { %s176_s27 = scalar_lea.vmem (%p51_p3), %s1195_s0, %s827_s23  ;;  %s170_s28 = scalar_lea.vmem (%p51_p3), [#allocation3], %s775_s24 }
  0x12   : > { %v189_v0 = vld [vmem:[%s176_s27] sm:$0xff] (%p51_p3)  ;;  %v191_v1 = vld [vmem:[%s176_s27 + $0x8] sm:$0xff] (%p51_p3) }
  0x13   : > { %v193_v2 = vld [vmem:[%s176_s27 + $0x20] sm:$0xff] (%p51_p3)  ;;  %190 = vst [vmem:[%s170_s28] sm:$0xff] (%p51_p3), %v189_v0  ;;  %192 = vst [vmem:[%s170_s28 + $0x8] sm:$0xff] (%p51_p3), %v191_v1  ;;  %v195_v3 = vld [vmem:[%s176_s27 + $0x28] sm:$0xff] (%p51_p3) }
  0x14   : > { %194 = vst [vmem:[%s170_s28 + $0x10] sm:$0xff] (%p51_p3), %v193_v2  ;;  %196 = vst [vmem:[%s170_s28 + $0x18] sm:$0xff] (%p51_p3), %v195_v3 }
  0x16 PF: > { %p778_p6 = scmp.ge.s32.totalorder %s1030_s16, 1  ;;  %p213_p7 = scmp.lt.s32.totalorder %s1030_s16, 3 }
  0x18   : > { %p214_p8 = pnand %p778_p6, %p213_p7 }
  0x19   : > { %s220_s29 = sand.u32 (!%p214_p8), 1, %s1014_s12   ;;  %s780_s30 = sshll.u32 (!%p214_p8), %s1022_s14, 6 }
  0x1a   : > { %217 = sbr.rel (%p214_p8) target bundleno = 335 (0x14f), region = 51  ;;  %s779_s4 = sshll.u32 (!%p214_p8), %s220_s29, 5 }
  0x1b   : > { %p252_p9 = scmp.lt.s32.totalorder (!%p214_p8), %s780_s30, 127  ;;  %s1109_s9 = scalar_lea.vmem (!%p214_p8), [#allocation3], %s779_s4 }
  0x1c   : > { %p782_p10 = scmp.ne.s32.totalorder (!%p214_p8), %s1022_s14, 0 }
  0x21   : > { %s1207_s30 = smov (!%p252_p9, %s780_s30), 127  ;;  %268 = sbr.rel (%p782_p10) target bundleno = 40 (0x28), region = 59 }
  0x22   : > { %s781_s5 = sshll.u32 %s1207_s30, 2  ;;  %vm269_vm0 = vcmask (!%p782_p10), 261120   ;;  %v1032_v4 = vmov (!%p782_p10), 0.0  }
  0x23   : > { %s1107_s8 = scalar_lea.vmem %s1196_s1, %s781_s5  ;;  %270 = vst.msk [vmem:[#allocation2] sm:$0xff] (!%p782_p10), %vm269_vm0, %v1032_v4  ;;  %271 = vst.msk [vmem:[#allocation2 + $0x8] sm:$0xff] (!%p782_p10), %vm269_vm0, %v1032_v4 }
  0x28 PF: > { %v924_v5 = vld [vmem:[%s1107_s8 + $0x40] sm:$0xff]   ;;  %v928_v9 = vld [vmem:[%s1107_s8 + $0x48] sm:$0xff]   ;;  %v932_v13 = vld [vmem:[%s1107_s8 + $0x50] sm:$0xff]   ;;  %vm638_vm1 = vcmask 261120   ;;  %p819_p11 = scmp.ne.s32.totalorder %s1022_s14, 1 }
  0x29   : > { %v925_v6 = vld [vmem:[%s1107_s8 + $0xc0] sm:$0xff]   ;;  %830 = vmatprep.subr.bf16.mxu0 %v924_v5  ;;  %v929_v10 = vld [vmem:[%s1107_s8 + $0xc8] sm:$0xff]   ;;  %v933_v14 = vld [vmem:[%s1107_s8 + $0xd0] sm:$0xff]   ;;  %vm664_vm2 = vcmask (!%p819_p11), 257024  }
  0x2a   : > { %v926_v7 = vld [vmem:[%s1107_s8] sm:$0xff]   ;;  %852 = vmatprep.subr.bf16.mxu1 %v925_v6  ;;  %v930_v11 = vld [vmem:[%s1107_s8 + $0x8] sm:$0xff]   ;;  %v934_v15 = vld [vmem:[%s1107_s8 + $0x10] sm:$0xff]  }
  0x2b   : > { %v927_v8 = vld [vmem:[%s1107_s8 + $0x80] sm:$0xff]   ;;  %831 = vmatpush3.bf16.msra.mxu0 %v926_v7  ;;  %v931_v12 = vld [vmem:[%s1107_s8 + $0x88] sm:$0xff]   ;;  %v935_v16 = vld [vmem:[%s1107_s8 + $0x90] sm:$0xff]  }
  0x2c   : > { %853 = vmatpush3.bf16.msra.mxu1 %v927_v8  ;;  %832 = vmatprep.subr.bf16.mxu0 %v928_v9  ;;  %v936_v17 = vld [vmem:[%s1107_s8 + $0x58] sm:$0xff]   ;;  %v940_v21 = vld [vmem:[%s1107_s8 + $0x60] sm:$0xff]   ;;  %v944_v25 = vld [vmem:[%s1107_s8 + $0x68] sm:$0xff]  }
  0x2d   : > { %854 = vmatprep.subr.bf16.mxu1 %v929_v10  ;;  %v937_v18 = vld [vmem:[%s1107_s8 + $0xd8] sm:$0xff]   ;;  %v941_v22 = vld [vmem:[%s1107_s8 + $0xe0] sm:$0xff]   ;;  %v945_v26 = vld [vmem:[%s1107_s8 + $0xe8] sm:$0xff]  }
  0x2e   : > { %v938_v19 = vld [vmem:[%s1107_s8 + $0x18] sm:$0xff]   ;;  %v942_v23 = vld [vmem:[%s1107_s8 + $0x20] sm:$0xff]   ;;  %v946_v27 = vld [vmem:[%s1107_s8 + $0x28] sm:$0xff]  }
  0x2f   : > { %833 = vmatpush3.bf16.msra.mxu0 %v930_v11  ;;  %v939_v20 = vld [vmem:[%s1107_s8 + $0x98] sm:$0xff]   ;;  %v943_v24 = vld [vmem:[%s1107_s8 + $0xa0] sm:$0xff]   ;;  %v947_v28 = vld [vmem:[%s1107_s8 + $0xa8] sm:$0xff]  }
  0x30   : > { %855 = vmatpush3.bf16.msra.mxu1 %v931_v12  ;;  %834 = vmatprep.subr.bf16.mxu0 %v932_v13  ;;  %v948_v29 = vld [vmem:[%s1107_s8 + $0x70] sm:$0xff]   ;;  %v952_v33 = vld [vmem:[%s1107_s8 + $0x78] sm:$0xff]   ;;  %v272_v50 = vld [vmem:[#allocation2] sm:$0xff] }
  0x31   : > { %856 = vmatprep.subr.bf16.mxu1 %v933_v14  ;;  %v949_v30 = vld [vmem:[%s1107_s8 + $0xf0] sm:$0xff]   ;;  %v953_v34 = vld [vmem:[%s1107_s8 + $0xf8] sm:$0xff]   ;;  %v273_v55 = vld [vmem:[#allocation2 + $0x8] sm:$0xff] }
  0x32   : > { %v950_v31 = vld [vmem:[%s1107_s8 + $0x30] sm:$0xff]   ;;  %v954_v35 = vld [vmem:[%s1107_s8 + $0x38] sm:$0xff]   ;;  %v820_v60 = vld [vmem:[%s1197_s2] ss:$0 sm:$0xff] (!%p819_p11) }
  0x33   : > { %835 = vmatpush3.bf16.msra.mxu0 %v934_v15  ;;  %v951_v32 = vld [vmem:[%s1107_s8 + $0xb0] sm:$0xff]   ;;  %v955_v36 = vld [vmem:[%s1107_s8 + $0xb8] sm:$0xff]  }
  0x34   : > { %857 = vmatpush3.bf16.msra.mxu1 %v935_v16  ;;  %836 = vmatprep.subr.bf16.mxu0 %v936_v17  ;;  %v956_v37 = vld [vmem:[%s1109_s9] ss:$16 sps:$4 sm:$0xff]   ;;  %v958_v38 = vld [vmem:[%s1109_s9 + $0x4] ss:$16 sps:$4 sm:$0xff]   ;;  %v959_v39 = vld [vmem:[%s1109_s9 + $0x8] ss:$16 sps:$4 sm:$0xff]  }
  0x35   : > { %858 = vmatprep.subr.bf16.mxu1 %v937_v18  ;;  %v961_v40 = vld [vmem:[%s1109_s9 + $0xc] ss:$16 sps:$4 sm:$0xff]   ;;  %586 = vmatprep.mubr.bf16.mxu0 %v958_v38 }
  0x36   : > { %627 = vmatprep.mubr.bf16.mxu1 %v961_v40 }
  0x37   : > { %837 = vmatpush3.bf16.msra.mxu0 %v938_v19 }
  0x38   : > { %859 = vmatpush3.bf16.msra.mxu1 %v939_v20  ;;  %838 = vmatprep.subr.bf16.mxu0 %v940_v21 }
  0x39   : > { %860 = vmatprep.subr.bf16.mxu1 %v941_v22 }
  0x3b   : > { %839 = vmatpush3.bf16.msra.mxu0 %v942_v23 }
  0x3c   : > { %861 = vmatpush3.bf16.msra.mxu1 %v943_v24  ;;  %840 = vmatprep.subr.bf16.mxu0 %v944_v25 }
  0x3d   : > { %862 = vmatprep.subr.bf16.mxu1 %v945_v26 }
  0x3f   : > { %841 = vmatpush3.bf16.msra.mxu0 %v946_v27 }
  0x40   : > { %863 = vmatpush3.bf16.msra.mxu1 %v947_v28  ;;  %842 = vmatprep.subr.bf16.mxu0 %v948_v29 }
  0x41   : > { %864 = vmatprep.subr.bf16.mxu1 %v949_v30 }
  0x43   : > { %843 = vmatpush3.bf16.msra.mxu0 %v950_v31 }
  0x44   : > { %865 = vmatpush3.bf16.msra.mxu1 %v951_v32  ;;  %844 = vmatprep.subr.bf16.mxu0 %v952_v33 }
  0x45   : > { %866 = vmatprep.subr.bf16.mxu1 %v953_v34 }
  0x47   : > { %845 = vmatpush3.bf16.msra.mxu0 %v954_v35 }
  0x48   : > { %867 = vmatpush3.bf16.msra.mxu1 %v955_v36 }
  0x4a   : > { %587 = vmatmul.mubr.bf16.vlgmr.msra.gmra.mrb[0].mxu0 %v956_v37 }
  0x4b   : > { %628 = vmatmul.mubr.bf16.vlgmr.msra.gmra.mrb[0].mxu1 %v959_v39 }
 0x11d   : > { %v846_v41 = vpop.f32.mrb[0].mxu0 }
 0x11e   : > { %v868_v42 = vpop.f32.mrb[0].mxu1  ;;  %v847_v43 = vpop.f32.mrb[1].mxu0 }
 0x11f   : > { %v848_v44 = vadd.f32 %v847_v43, %v846_v41  ;;  %v869_v45 = vpop.f32.mrb[1].mxu1  ;;  %v849_v46 = vpop.f32.mrb[2].mxu0 }
 0x120   : > { %v870_v47 = vadd.f32 %v869_v45, %v868_v42  ;;  %v871_v48 = vpop.f32.mrb[2].mxu1  ;;  %v850_v49 = vpop.f32.mrb[3].mxu0 }
 0x121   : > { %v851_v51 = vadd.f32 %v850_v49, %v849_v46  ;;  %v872_v52 = vpop.f32.mrb[3].mxu1 }
 0x122   : > { %v630_v53 = vadd.f32 %v870_v47, %v848_v44  ;;  %v873_v54 = vadd.f32 %v872_v52, %v871_v48  ;;  %644 = sbr.rel (%p819_p11) target bundleno = 309 (0x135), region = 63 }
 0x124   : > { %v636_v56 = vadd.f32 %v630_v53, %v272_v50  ;;  %v633_v57 = vadd.f32 %v873_v54, %v851_v51 }
 0x126   : > { %639 = vst.msk [vmem:[#allocation2] sm:$0xff] %vm638_vm1, %v636_v56  ;;  %v637_v58 = vadd.f32 %v633_v57, %v273_v55 }
 0x128   : > { %640 = vst.msk [vmem:[#allocation2 + $0x8] sm:$0xff] %vm638_vm1, %v637_v58 }
 0x12d   : > { %v645_v59 = vld [vmem:[#allocation2] sm:$0xff] }
 0x12e   : > { %v654_v62 = vadd.f32 %v820_v60, %v645_v59 }
 0x12f   : > { %v646_v61 = vld [vmem:[#allocation2 + $0x8] sm:$0xff] }
 0x130   : > { %v655_v63 = vadd.f32 %v820_v60, %v646_v61  ;;  %v828_v0 = vpack.c.bf16 %v654_v62, %v654_v62 }
 0x132   : > { %v829_v1 = vpack.c.bf16 %v655_v63, %v655_v63  ;;  %665 = vst.msk [vmem:[#allocation4] sm:$0xf] %vm664_vm2, %v828_v0 }
 0x134   : > { %666 = vst.msk [vmem:[#allocation4 + $0x4] sm:$0xf] %vm664_vm2, %v829_v1 }
 0x135 PF: > { %p1154_p12 = scmp.eq.s32.totalorder %s771_s17, 1  ;;  %s1033_s14 = smov [#allocation4]  }
 0x136   : > { %s677_s19 = sshll.u32 %s1033_s14, 4  ;;  %s678_s19 = int_to_ptr.vmem [resolvable:$true] %s677_s19 }
 0x137   : > { %s962_s20 = scalar_lea.vmem %s678_s19, 128  ;;  %p969_p2 = scmp.lt.s32.totalorder %s678_s19, %s678_s19 }
 0x138   : > { %p963_p13 = scmp.ne.s32.totalorder %s678_s19, %s962_s20  ;;  %p970_p3 = scmp.lt.s32.totalorder %s962_s20, %s962_s20 }
 0x13a   : > { %p964_p0 = pnand %p963_p13, %p1154_p12  ;;  %p971_p4 = por %p970_p3, %p969_p2 }
 0x13c   : > { %p965_p1 = pneg %p964_p0 }
 0x13e   : > { %p972_p5 = pnand %p971_p4, %p965_p1 }
 0x140   : > { %975 = shalt.err (!%p972_p5)
}
 0x141   : > { %s976_s17 = scalar_lea.hbm %s1198_s3, 128 }
 0x142   : > { %p977_p6 = scmp.ne.s32.totalorder %s1198_s3, %s976_s17  ;;  %p982_p9 = scmp.lt.u32.totalorder %s976_s17, %s1198_s3 }
 0x144   : > { %p978_p7 = pnand %p977_p6, %p1154_p12 }
 0x146   : > { %p979_p8 = pneg %p978_p7 }
 0x148   : > { %p984_p10 = pnand %p982_p9, %p979_p8 }
 0x14a   : > { %987 = shalt.err (!%p984_p10)
}
 0x14b   : > { %s1034_s28 = smov 64   ;;  %s1035_s29 = smov 4  }
 0x14c   : > { %875 = dma.vmem_to_hbm [thread:$0]  (%p1154_p12), %s678_s19, 128, %s1198_s3, [#allocation5], %s1034_s28, %s1034_s28, %s1035_s29  }
 0x14d   : > { %1009 = dma.done.wait (%p1154_p12), [#allocation5], 128  }
 0x14e   : > { %1011 = vsyncadd (%p1154_p12), [#allocation5], 4294967168 }
 0x14f PF: > { %s14_s16 = sadd.s32 1, %s1030_s16   ;;  %s1200_s12 = smov %s1018_s13 }
 0x150   : > { %p11_p11 = scmp.ge.s32.totalorder %s14_s16, 4   ;;  %s1201_s13 = smov %s1092_s21 }
 0x151   : > { %s1202_s14 = smov %s1026_s15  ;;  %s1203_s15 = smov %s1205_s18 }
 0x152   :  { %13 = sbr.rel (!%p11_p11) target bundleno = 3 (0x3), region = 102 }
 0x159   :  { %693 = vsyncpa [#allocation5], 1 }
 0x15a   :  { %695 = vsyncpa [#allocation5 + $0x1], 1 }

</bundles_post_ra>
